<compile_context>
chip_gen: v5e
topology: v5e:2x2
jax: 0.10.0
libtpu: 0.0.40
codegen_flags: <defaults>
</compile_context>

<pallas_src>
import jax
import jax.numpy as jnp
from jax.experimental import pallas as pl
from jax.experimental.pallas import tpu as pltpu


def _normalize_kernel(scale_ref, bias_ref, x_ref, o_ref):
    # scale_ref / bias_ref: SMEM arrays of shape (N*C,) float32
    # x_ref / o_ref:        VMEM tiles of shape (1, r_tile, lane)
    i = pl.program_id(0)
    s = scale_ref[i]
    b = bias_ref[i]
    o_ref[...] = (x_ref[...] * s + b).astype(o_ref.dtype)


def _choose_tiling(L, itemsize, target_block_bytes=2 << 20):
    """Pick (rows, lane, r_tile) with rows * lane == L.

    lane is the widest of (2048, 1024, 512, 256, 128) that divides L so the
    minor block dim is a multiple of 128 (unmasked vector stores).  r_tile is a
    multiple of 8 (or the full row extent) sized toward ~target_block_bytes.
    """
    lane = None
    for cand in (2048, 1024, 512, 256, 128):
        if L % cand == 0:
            lane = cand
            break
    if lane is None:
        # No lane-dense factorisation available; fall back to one full-width row.
        # TODO(synk): pad L up to a multiple of 128 in the wrapper if this path
        # ever matters for real shapes (video T*H*W is normally 128-divisible).
        return 1, L, 1
    rows = L // lane
    rows_target = max(1, target_block_bytes // (lane * itemsize))
    if rows_target >= rows:
        r_tile = rows                            # full extent -> always legal
    else:
        r_tile = max(8, (rows_target // 8) * 8)  # multiple of 8 -> legal sublane block
    return rows, lane, r_tile


def normalize(x, mean, std):
    """(x - mean) / std with mean/std broadcast over channel axis 1.

    x:    (N, C, T, H, W)   (C == 3 for the PyTorch module)
    mean: (C,)
    std:  (C,)
    """
    N, C, T, H, W = x.shape
    L = T * H * W

    mean_f = jnp.asarray(mean, dtype=jnp.float32).reshape(C)
    std_f = jnp.asarray(std, dtype=jnp.float32).reshape(C)
    # Fold into a single FMA: (x - m) / s  ==  x * (1/s) + (-m/s).
    scale = jnp.tile(1.0 / std_f, N)        # (N*C,) float32, one entry per slab
    bias = jnp.tile(-mean_f / std_f, N)     # (N*C,) float32

    rows, lane, r_tile = _choose_tiling(L, jnp.dtype(x.dtype).itemsize)
    x3 = x.reshape(N * C, rows, lane)

    grid = (N * C, pl.cdiv(rows, r_tile))
    block = (1, r_tile, lane)

    out = pl.pallas_call(
        _normalize_kernel,
        out_shape=jax.ShapeDtypeStruct(x3.shape, x.dtype),
        grid_spec=pltpu.PrefetchScalarGridSpec(
            num_scalar_prefetch=0,
            grid=grid,
            in_specs=[
                pl.BlockSpec(memory_space=pltpu.MemorySpace.SMEM),   # scale (N*C,)
                pl.BlockSpec(memory_space=pltpu.MemorySpace.SMEM),   # bias  (N*C,)
                pl.BlockSpec(block, lambda i, r: (i, r, 0)),         # x tile
            ],
            out_specs=pl.BlockSpec(block, lambda i, r: (i, r, 0)),
        ),
        compiler_params=pltpu.CompilerParams(
            # Fully elementwise — both grid axes independent (megacore-friendly).
            dimension_semantics=("parallel", "parallel"),
        ),
    )(scale, bias, x3)

    return out.reshape(N, C, T, H, W)


if __name__ == "__main__":
    key = jax.random.PRNGKey(0)
    # Small video-shaped input consistent with the (1, 3, 1, 1, 1) broadcast.
    N, C, T, H, W = 2, 3, 4, 16, 16
    x = jax.random.normal(key, (N, C, T, H, W), dtype=jnp.float32)

    # Deterministic "buffers" (standard video normalization constants).
    mean = jnp.array([0.485, 0.456, 0.406], dtype=jnp.float32)
    std = jnp.array([0.229, 0.224, 0.225], dtype=jnp.float32)

    out = normalize(x, mean, std)
    jax.block_until_ready(out)

    # Reference check in plain JAX.
    ref = (x - mean.reshape(1, 3, 1, 1, 1)) / std.reshape(1, 3, 1, 1, 1)
    assert out.shape == ref.shape
    assert jnp.allclose(out, ref, atol=1e-5, rtol=1e-5)

    print("KERNEL_OK")
</pallas_src>

<mosaic_0001>
module attributes {stable_mosaic.version = 11 : i64} {
  func.func @_normalize_kernel(%arg0: i32, %arg1: i32, %arg2: memref<6xf32, #tpu.memory_space<smem>>, %arg3: memref<6xf32, #tpu.memory_space<smem>>, %arg4: memref<1x1x1024xf32, #tpu.memory_space<vmem>>, %arg5: memref<1x1x1024xf32, #tpu.memory_space<vmem>>) attributes {dimension_semantics = [#tpu.dimension_semantics<parallel>, #tpu.dimension_semantics<parallel>], iteration_bounds = array<i64: 6, 1>, scalar_prefetch = 0 : i64, scratch_operands = 0 : i64, tpu.core_type = #tpu.core_type<tc>, window_params = [{transform_indices = @transform_0, window_bounds = array<i64: 6>}, {transform_indices = @transform_1, window_bounds = array<i64: 6>}, {transform_indices = @transform_2, window_bounds = array<i64: 1, 1, 1024>}, {transform_indices = @transform_3, window_bounds = array<i64: 1, 1, 1024>}]} {
    %0 = arith.index_cast %arg0 : i32 to index
    %1 = memref.load %arg2[%0] : memref<6xf32, #tpu.memory_space<smem>>
    %2 = arith.index_cast %arg0 : i32 to index
    %3 = memref.load %arg3[%2] : memref<6xf32, #tpu.memory_space<smem>>
    %c0 = arith.constant 0 : index
    %c0_0 = arith.constant 0 : index
    %c0_1 = arith.constant 0 : index
    %4 = vector.load %arg4[%c0, %c0_0, %c0_1] : memref<1x1x1024xf32, #tpu.memory_space<vmem>>, vector<1x1x1024xf32>
    %5 = vector.broadcast %1 : f32 to vector<1x1x1024xf32>
    %6 = arith.mulf %4, %5 : vector<1x1x1024xf32>
    %7 = vector.broadcast %3 : f32 to vector<1x1x1024xf32>
    %8 = arith.addf %6, %7 : vector<1x1x1024xf32>
    %c0_2 = arith.constant 0 : index
    %c0_3 = arith.constant 0 : index
    %c0_4 = arith.constant 0 : index
    %9 = vector.load %arg5[%c0_2, %c0_3, %c0_4] : memref<1x1x1024xf32, #tpu.memory_space<vmem>>, vector<1x1x1024xf32>
    tpu.vector_store %arg5[%c0_2, %c0_3, %c0_4], %8 {strides = array<i32>} : memref<1x1x1024xf32, #tpu.memory_space<vmem>>, vector<1x1x1024xf32>,
    return
  }
  func.func @transform_0(%arg0: i32, %arg1: i32) -> i32 {
    %c0_i32 = arith.constant 0 : i32
    %c0_i32_0 = arith.constant 0 : i32
    return %c0_i32 : i32
  }
  func.func @transform_1(%arg0: i32, %arg1: i32) -> i32 {
    %c0_i32 = arith.constant 0 : i32
    %c0_i32_0 = arith.constant 0 : i32
    return %c0_i32 : i32
  }
  func.func @transform_2(%arg0: i32, %arg1: i32) -> (i32, i32, i32) {
    %c0_i32 = arith.constant 0 : i32
    %c0_i32_0 = arith.constant 0 : i32
    return %arg0, %arg1, %c0_i32 : i32, i32, i32
  }
  func.func @transform_3(%arg0: i32, %arg1: i32) -> (i32, i32, i32) {
    %c0_i32 = arith.constant 0 : i32
    %c0_i32_0 = arith.constant 0 : i32
    return %arg0, %arg1, %c0_i32 : i32, i32, i32
  }
}

</mosaic_0001>

<bundles_post_ra>
// kernel: tpu_custom_call.1
= control target key start
LH: loop header
LB: loop body
LE: loop exit
PB: predicated region body
PF: predicated region fallthrough
CT: control target
= control target key end

     0   :  { %8 = vsyncpa [#allocation5], 0  ;;  %s783_s0 = inlined_call_operand.hbm [shape: f32[6], index: 0, kind: input, shape index: {}]   ;;  %s784_s1 = inlined_call_operand.hbm [shape: f32[6], index: 1, kind: input, shape index: {}]   ;;  %s785_s2 = inlined_call_operand.hbm [shape: f32[6,1,1024], index: 2, kind: input, shape index: {}]   ;;  %s786_s3 = inlined_call_operand.hbm [shape: f32[6,1,1024], index: 3, kind: output, shape index: {}]  }
   0x1   :  { %9 = vsyncpa [#allocation7], 0 }
   0x2   :  { %10 = vsyncpa [#allocation3], 0 }
   0x3   :  { %12 = vsyncpa [#allocation3 + $0x1], 0 }
   0x4   :  { %13 = vsyncpa [#allocation4], 0 }
   0x5   :  { %15 = vsyncpa [#allocation4 + $0x1], 0  ;;  %s637_s12 = smov 0   ;;  %s639_s13 = smov 0  }
   0x6   :  { %s641_s14 = smov 0   ;;  %s643_s15 = smov 0  }
   0x7   :  { %s645_s16 = smov 0   ;;  %s647_s17 = smov 0  }
   0x8 LB: > { %s363_s18 = sadd.s32 4294967295, %s613_s17   ;;  %s364_s19 = sadd.s32 4294967294, %s613_s17   ;;  %s613_s17 = sphi %s647_s17, %s21_s17   ;;  %s609_s16 = sphi %s645_s16, %s796_s16   ;;  %s605_s15 = sphi %s643_s15, %s795_s15   ;;  %s601_s14 = sphi %s641_s14, %s794_s14   ;;  %s597_s13 = sphi %s639_s13, %s793_s13   ;;  %s593_s12 = sphi %s637_s12, %s792_s12  }
   0x9   : > { %p97_p0 = scmp.ne.s32.totalorder %s597_s13, %s593_s12  ;;  %p671_p1 = scmp.eq.s32.totalorder %s363_s18, 0 }
   0xa   : > { %p129_p2 = scmp.eq.s32.totalorder %s364_s19, 5  ;;  %p365_p4 = scmp.ge.s32.totalorder %s613_s17, 1 }
   0xb   : > { %p677_p3 = por %p671_p1, %p97_p0  ;;  %p136_p6 = scmp.lt.s32.totalorder %s613_s17, 7 }
   0xc   : > { %p682_p5 = por %p129_p2, %p97_p0  ;;  %s148_s25 = sshll.u32 %s783_s0, 4  ;;  %s149_s25 = int_to_ptr.hbm [resolvable:$true] %s148_s25 }
   0xd   : > { %p690_p7 = pnand %p365_p4, %p136_p6  ;;  %s158_s29 = sshll.u32 %s784_s1, 4  ;;  %s159_s29 = int_to_ptr.hbm [resolvable:$true] %s158_s29 }
   0xe   : > { %s615_s30 = smov [#allocation2]   ;;  %s616_s4 = smov [#allocation6]  }
   0xf   : > { %p392_p8 = pneg %p690_p7  ;;  %p123_p10 = scmp.eq.s32.totalorder %s363_s18, 5 }
  0x10   : > { %s33_s5 = sadd.s32 1, %s609_s16  ;;  %s84_s6 = sadd.s32 1, %s601_s14 }
  0x11   : > { %p393_p9 = pnand %p392_p8, %p671_p1  ;;  %p35_p11 = scmp.ge.s32.totalorder %s33_s5, 6 }
  0x12   : > { %p91_p12 = scmp.ne.s32.totalorder %s601_s14, %s597_s13  ;;  %p92_p13 = scmp.eq.s32.totalorder %s613_s17, 0 }
  0x13   : > { %395 = dma.hbm_to_smem (!%p393_p9), %s149_s25, 16, %s615_s30, [#allocation5]  }
  0x14   : > { %398 = dma.hbm_to_smem (!%p393_p9), %s159_s29, 16, %s616_s4, [#allocation7]  }
  0x15   : > { %s798_s5 = smov (%p35_p11, %s33_s5), 0  ;;  %p708_p0 = por %p123_p10, %p91_p12 }
  0x16   : > { %p409_p2 = scmp.lt.s32.totalorder %s613_s17, 6  ;;  %s79_s8 = ssub.s32 %s609_s16, %s798_s5 }
  0x17   : > { %s169_s9 = sand.u32 1, %s601_s14   ;;  %p82_p4 = scmp.eq.s32.totalorder %s79_s8, 0 }
  0x18   : > { %p93_p6 = por %p92_p13, %p91_p12  ;;  %s369_s10 = sshll.u32 %s169_s9, 3 }
  0x19   : > { %s370_s11 = sshll.u32 %s609_s16, 3  ;;  %s173_s27 = scalar_lea.vmem [#allocation8], %s369_s10 }
  0x1a   : > { %s718_s18 = scalar_select %p82_p4, %s601_s14, %s84_s6  }
  0x1b   : > { %s179_s24 = scalar_lea.hbm %s785_s2, %s370_s11  ;;  %s183_s28 = sshll.u32 %s173_s27, 4  ;;  %s184_s28 = int_to_ptr.vmem [resolvable:$true] %s183_s28 }
  0x1c   : > { %s181_s25 = sshll.u32 %s179_s24, 4  ;;  %p400_p8 = pnand %p409_p2, %p93_p6  ;;  %s182_s25 = int_to_ptr.hbm [resolvable:$true] %s181_s25 }
  0x1d   : > { %s170_s29 = scalar_lea.sflag [#allocation3], %s169_s9  ;;  %192 = sbr.rel (%p690_p7) target bundleno = 59 (0x3b), region = 32 }
  0x1e   : > { %402 = dma.hbm_to_vmem [thread:$0]  (!%p400_p8), %s182_s25, 128, %s184_s28, %s170_s29  }
  0x22   : > { %576 = dma.done.wait (%p671_p1), [#allocation5], 16  }
  0x23   : > { %578 = vsyncadd (%p671_p1), [#allocation5], 4294967280 }
  0x24   : > { %580 = dma.done.wait (%p671_p1), [#allocation7], 16  }
  0x25   : > { %582 = vsyncadd (%p671_p1), [#allocation7], 4294967280  ;;  %s736_s30 = sand.u32 1, %s597_s13  }
  0x26   : > { %s374_s26 = sshll.u32 %s736_s30, 3  ;;  %s205_s4 = scalar_lea.sflag [#allocation3], %s736_s30 }
  0x27   : > { %s208_s6 = scalar_lea.vmem [#allocation8], %s374_s26 }
  0x28   : > { %584 = dma.done.wait (%p677_p3), %s205_s4, 128  }
  0x29   : > { %586 = vsyncadd (%p677_p3), %s205_s4, 4294967168 }
  0x2a   : > { %214 = sfence }
  0x2b   : > { %s233_s20 = sld [smem:[#allocation2 + %s605_s15]]  ;;  %s377_s9 = sshll.u32 %s605_s15, 3  ;;  %v235_v0 = vld [vmem:[%s208_s6] sm:$0xff] }
  0x2c   : > { %s234_s8 = sld [smem:[#allocation6 + %s605_s15]]  ;;  %s254_s19 = scalar_lea.hbm %s786_s3, %s377_s9 }
  0x2d   : > { %s232_s23 = scalar_lea.vmem [#allocation9], %s374_s26  ;;  %s258_s25 = sshll.u32 %s254_s19, 4  ;;  %s259_s25 = int_to_ptr.hbm [resolvable:$true] %s258_s25 }
  0x2e   : > { %s256_s24 = sshll.u32 %s232_s23, 4  ;;  %s242_s21 = scalar_lea.sflag [#allocation4], %s736_s30  ;;  %s257_s24 = int_to_ptr.vmem [resolvable:$true] %s256_s24 }
  0x2f   : > { %s537_s27 = sshra.s32 %s259_s25, 4  ;;  %s543_s26 = scalar_lea.hbm %s786_s3, 48  ;;  %s538_s27 = int_to_ptr.hbm [resolvable:$true] %s537_s27 }
  0x30   : > { %s539_s15 = scalar_lea.hbm %s538_s27, 8  ;;  %p544_p9 = scmp.lt.s32.totalorder %s538_s27, %s786_s3 }
  0x31   : > { %v236_v1 = vstv %s233_s20  ;;  %p540_p1 = scmp.ne.s32.totalorder %s538_s27, %s539_s15  ;;  %p545_p10 = scmp.lt.s32.totalorder %s543_s26, %s539_s15 }
  0x32   : > { %v237_v2 = vmul.f32 %v236_v1, %v235_v0  ;;  %v238_v3 = vstv %s234_s8 }
  0x33   : > { %p541_p3 = pnand %p540_p1, %p708_p0  ;;  %p546_p11 = por %p545_p10, %p544_p9 }
  0x34   : > { %v239_v4 = vadd.f32 %v238_v3, %v237_v2 }
  0x35   : > { %p542_p7 = pneg %p541_p3 }
  0x36   : > { %240 = vst [vmem:[%s232_s23] sm:$0xff] %v239_v4 }
  0x37   : > { %p547_p12 = pnand %p546_p11, %p542_p7 }
  0x39   : > { %550 = shalt.err (!%p547_p12)
}
  0x3a   : > { %390 = dma.vmem_to_hbm [thread:$0]  (%p708_p0), %s257_s24, 128, %s259_s25, %s242_s21  }
  0x3b PF: > { %p412_p13 = scmp.ge.s32.totalorder %s613_s17, 2  ;;  %s270_s30 = sand.u32 1, %s593_s12  }
  0x3c   : > { %s271_s20 = scalar_lea.sflag [#allocation4], %s270_s30 }
  0x3d   : > { %p404_p2 = pnand %p412_p13, %p682_p5 }
  0x3f   : > { %p405_p4 = pneg %p404_p2 }
  0x41   : > { %588 = dma.done.wait (%p405_p4), %s271_s20, 128  }
  0x42   : > { %590 = vsyncadd (%p405_p4), %s271_s20, 4294967168  ;;  %s21_s17 = sadd.s32 1, %s613_s17   ;;  %s792_s12 = smov %s597_s13 }
  0x43   : > { %p18_p6 = scmp.ge.s32.totalorder %s21_s17, 8   ;;  %s793_s13 = smov %s601_s14 }
  0x44   : > { %s794_s14 = smov %s718_s18  ;;  %s795_s15 = smov %s609_s16 }
  0x45   : > { %s796_s16 = smov %s798_s5  ;;  %20 = sbr.rel (!%p18_p6) target bundleno = 8 (0x8), region = 86 }
  0x4a   :  { %277 = vsyncpa [#allocation3], 1 }
  0x4b   :  { %279 = vsyncpa [#allocation3 + $0x1], 1 }
  0x4c   :  { %280 = vsyncpa [#allocation4], 1 }
  0x4d   :  { %282 = vsyncpa [#allocation4 + $0x1], 1 }
  0x4e   :  { %283 = vsyncpa [#allocation5], 1 }
  0x4f   :  { %285 = vsyncpa [#allocation5 + $0x1], 1 }
  0x50   :  { %286 = vsyncpa [#allocation7], 1 }

</bundles_post_ra>
